<compile_context>
chip_gen: v7x
topology: tpu7x:2x2x1
jax: 0.10.0
libtpu: 0.0.40
codegen_flags: <defaults>
</compile_context>

<pallas_src>
import functools

import jax
import jax.numpy as jnp
from jax.experimental import pallas as pl
from jax.experimental.pallas import tpu as pltpu

EPS = 1e-5  # BatchNorm1d default


def _round_up(x, m):
    return (x + m - 1) // m * m


def _vmem_limit_bytes():
    """Generation-aware VMEM budget: physical capacity minus ~15% headroom."""
    cap = 128 * 1024 * 1024  # v5e/v6e physical; safe fallback
    try:
        cap = int(pltpu.get_tpu_info().vmem_capacity_bytes)
    except Exception:
        pass
    return int(cap * 0.85)


def _pick_tcout(cout_pad):
    """Lane-dense cout tile; prefer an even number (>=2) of tiles so both v7x
    TensorCores get work on the "parallel" cout grid axis."""
    cands = [tc for tc in (512, 256, 128) if cout_pad % tc == 0]
    for tc in cands:
        nt = cout_pad // tc
        if nt >= 2 and nt % 2 == 0:
            return tc
    for tc in cands:
        if cout_pad // tc >= 2:
            return tc
    return cands[0]


# --------------------------------------------------------------------------
# Path 1: batch resident in VMEM, single fused pass per cout tile.
# --------------------------------------------------------------------------
def _fcn_resident_kernel(x_ref, w_ref, gb_ref, o_ref, *, inv_n):
    # x_ref : (N_pad, cin)   bf16, resident (constant block index across the grid)
    # w_ref : (cin, tcout)   bf16
    # gb_ref: (2, tcout)     f32 -- row 0 gamma, row 1 beta
    # o_ref : (N_pad, tcout) out_dtype
    y = jnp.dot(x_ref[...], w_ref[...], preferred_element_type=jnp.float32)

    # Training-mode BatchNorm1d batch stats (biased), single pass in f32.
    # Zero-padded batch rows contribute nothing to either sum; inv_n uses the
    # true row count, so no masking pass is needed.
    mean = jnp.sum(y, axis=0, keepdims=True) * inv_n
    mean_sq = jnp.sum(y * y, axis=0, keepdims=True) * inv_n
    var = jnp.maximum(mean_sq - mean * mean, 0.0)
    # TODO(synk): E[y^2]-mean^2 can cancel when |mean| >> std of the pre-BN
    # activations; switch to a shifted two-pass variance if that regime matters.
    inv_std = jax.lax.rsqrt(var + EPS)

    scale = gb_ref[0:1, :] * inv_std          # gamma * inv_std
    shift = gb_ref[1:2, :] - mean * scale     # beta - mean * scale
    o_ref[...] = jnp.maximum(y * scale + shift, 0.0).astype(o_ref.dtype)


# --------------------------------------------------------------------------
# Path 2 (large N): two-pass tiled-N pipeline.
# --------------------------------------------------------------------------
def _fcn_stats_kernel(x_ref, w_ref, stats_ref, acc_ref):
    # grid = (cout tiles ["parallel"], N tiles ["arbitrary", reduction, last])
    @pl.when(pl.program_id(1) == 0)
    def _():
        acc_ref[...] = jnp.zeros_like(acc_ref)

    y = jnp.dot(x_ref[...], w_ref[...], preferred_element_type=jnp.float32)
    acc_ref[0:1, :] += jnp.sum(y, axis=0, keepdims=True)
    acc_ref[1:2, :] += jnp.sum(y * y, axis=0, keepdims=True)

    @pl.when(pl.program_id(1) == pl.num_programs(1) - 1)
    def _():
        stats_ref[...] = acc_ref[...]


def _fcn_apply_kernel(x_ref, w_ref, ss_ref, o_ref):
    # ss_ref: (2, tcout) f32 -- row 0 scale, row 1 shift (folded gamma/beta/mean/var)
    y = jnp.dot(x_ref[...], w_ref[...], preferred_element_type=jnp.float32)
    o_ref[...] = jnp.maximum(y * ss_ref[0:1, :] + ss_ref[1:2, :], 0.0).astype(o_ref.dtype)


# --------------------------------------------------------------------------
# Wrapper
# --------------------------------------------------------------------------
def fcn_forward(x, w, b, gamma, beta, *, matmul_dtype=jnp.bfloat16,
                out_dtype=jnp.bfloat16, force_two_pass=False):
    """x: (kk, t, cin) -> (kk, t, cout). Matches FCN.forward (training-mode BN).

    `b` (the nn.Linear bias) is accepted for interface parity but unused: it
    cancels exactly under training-mode BatchNorm.
    """
    del b
    kk, t, cin = x.shape
    cout = w.shape[1]
    n = kk * t

    row_mult = 16 if jnp.dtype(matmul_dtype).itemsize == 2 else 8
    n_pad = _round_up(max(n, row_mult), row_mult)
    cout_pad = _round_up(cout, 128)
    tcout = _pick_tcout(cout_pad)
    out_bytes = jnp.dtype(out_dtype).itemsize

    x2d = x.reshape(n, cin).astype(matmul_dtype)
    if n_pad != n:
        x2d = jnp.pad(x2d, ((0, n_pad - n), (0, 0)))

    w_p = w.astype(matmul_dtype)
    gamma_p = gamma.reshape(1, cout).astype(jnp.float32)
    beta_p = beta.reshape(1, cout).astype(jnp.float32)
    if cout_pad != cout:
        pad = cout_pad - cout
        w_p = jnp.pad(w_p, ((0, 0), (0, pad)))                               # zero cols -> zero y
        gamma_p = jnp.pad(gamma_p, ((0, 0), (0, pad)), constant_values=1.0)  # keep rsqrt finite
        beta_p = jnp.pad(beta_p, ((0, 0), (0, pad)))
    gb = jnp.concatenate([gamma_p, beta_p], axis=0)                          # (2, cout_pad)

    vmem_limit = _vmem_limit_bytes()

    # Estimate resident-path per-step VMEM (double-buffered operands + f32 y temp).
    resident_bytes = (
        2 * n_pad * cin * 2                 # x (double-buffered by default)
        + 2 * cin * tcout * 2               # W tile
        + 2 * 2 * tcout * 4                 # gamma/beta tile
        + 2 * n_pad * tcout * out_bytes     # out tile
        + 2 * n_pad * tcout * 4             # y / epilogue temporaries (headroom)
    )
    use_resident = (not force_two_pass) and resident_bytes <= int(vmem_limit * 0.7)

    if use_resident:
        out = pl.pallas_call(
            functools.partial(_fcn_resident_kernel, inv_n=1.0 / n),
            out_shape=jax.ShapeDtypeStruct((n_pad, cout_pad), out_dtype),
            grid=(cout_pad // tcout,),
            in_specs=[
                # TODO(synk): x / gb have constant block indices; pipeline_mode=pl.Buffered(1)
                # would reclaim the duplicate buffer and raise the resident-N ceiling.
                pl.BlockSpec((n_pad, cin), lambda j: (0, 0)),    # x: resident
                pl.BlockSpec((cin, tcout), lambda j: (0, j)),    # W tile
                pl.BlockSpec((2, tcout), lambda j: (0, j)),      # gamma/beta tile
            ],
            out_specs=pl.BlockSpec((n_pad, tcout), lambda j: (0, j)),
            compiler_params=pltpu.CompilerParams(
                dimension_semantics=("parallel",),   # shard cout tiles across TCs
                vmem_limit_bytes=vmem_limit,
            ),
        )(x2d, w_p, gb)
    else:
        # ---- Two-pass tiled-N path (large batches that don't fit resident) ----
        tn = min(512, n_pad)
        n_pad2 = _round_up(n_pad, tn)
        if n_pad2 != n_pad:
            x2d = jnp.pad(x2d, ((0, n_pad2 - n_pad), (0, 0)))
        n_tiles = n_pad2 // tn
        cout_tiles = cout_pad // tcout

        stats = pl.pallas_call(
            _fcn_stats_kernel,
            out_shape=jax.ShapeDtypeStruct((2, cout_pad), jnp.float32),
            grid=(cout_tiles, n_tiles),
            in_specs=[
                pl.BlockSpec((tn, cin), lambda j, i: (i, 0)),
                pl.BlockSpec((cin, tcout), lambda j, i: (0, j)),
            ],
            out_specs=pl.BlockSpec((2, tcout), lambda j, i: (0, j)),
            scratch_shapes=[pltpu.VMEM((2, tcout), jnp.float32)],
            compiler_params=pltpu.CompilerParams(
                dimension_semantics=("parallel", "arbitrary"),
                vmem_limit_bytes=vmem_limit,
            ),
        )(x2d, w_p)

        # Fold stats + gamma/beta into per-feature scale/shift (tiny, plain JAX).
        mean = stats[0:1, :] / n
        var = jnp.maximum(stats[1:2, :] / n - mean * mean, 0.0)
        inv_std = jax.lax.rsqrt(var + EPS)
        scale = gb[0:1, :] * inv_std
        shift = gb[1:2, :] - mean * scale
        ss = jnp.concatenate([scale, shift], axis=0)          # (2, cout_pad)

        out = pl.pallas_call(
            _fcn_apply_kernel,
            out_shape=jax.ShapeDtypeStruct((n_pad2, cout_pad), out_dtype),
            grid=(cout_tiles, n_tiles),
            in_specs=[
                pl.BlockSpec((tn, cin), lambda j, i: (i, 0)),
                pl.BlockSpec((cin, tcout), lambda j, i: (0, j)),
                pl.BlockSpec((2, tcout), lambda j, i: (0, j)),
            ],
            out_specs=pl.BlockSpec((tn, tcout), lambda j, i: (i, j)),
            compiler_params=pltpu.CompilerParams(
                dimension_semantics=("parallel", "parallel"),
                vmem_limit_bytes=vmem_limit,
            ),
        )(x2d, w_p, ss)

    # Slice only when padding was actually introduced (no copy otherwise).
    if out.shape != (n, cout):
        out = out[:n, :cout]
    return out.reshape(kk, t, cout)


def init_params(key, cin, cout):
    """Deterministic synthetic init mimicking nn.Linear + BatchNorm1d."""
    k_w, k_b = jax.random.split(key)
    bound = 1.0 / (cin ** 0.5)
    # Stored as (cin, cout) — equals PyTorch's weight.T — so the kernel does x @ W.
    w = jax.random.uniform(k_w, (cin, cout), jnp.float32, -bound, bound)
    b = jax.random.uniform(k_b, (cout,), jnp.float32, -bound, bound)
    gamma = jnp.ones((cout,), jnp.float32)   # BatchNorm1d weight init
    beta = jnp.zeros((cout,), jnp.float32)   # BatchNorm1d bias init
    return w, b, gamma, beta


if __name__ == "__main__":
    key = jax.random.PRNGKey(0)
    k_x, k_p = jax.random.split(key)

    # N = kk*t = 16 (16-aligned), cout = 128 (already 128-aligned -> no padding/slice).
    kk, t, cin, cout = 2, 8, 32, 128
    x = jax.random.normal(k_x, (kk, t, cin), jnp.float32)
    w, b, gamma, beta = init_params(k_p, cin, cout)

    # Pure-JAX reference: Linear (bias INCLUDED, to demonstrate it cancels under BN)
    # -> BatchNorm1d training stats -> ReLU, using the same bf16 matmul inputs.
    n = kk * t
    xb = x.reshape(n, cin).astype(jnp.bfloat16).astype(jnp.float32)
    wb = w.astype(jnp.bfloat16).astype(jnp.float32)
    y_ref = xb @ wb + b[None, :]
    mu = y_ref.mean(axis=0, keepdims=True)
    var = ((y_ref - mu) ** 2).mean(axis=0, keepdims=True)
    ref = jnp.maximum((y_ref - mu) / jnp.sqrt(var + EPS) * gamma[None, :] + beta[None, :], 0.0)
    ref = ref.reshape(kk, t, cout)

    # Path 1: VMEM-resident single-pass kernel.
    out = fcn_forward(x, w, b, gamma, beta)
    jax.block_until_ready(out)
    assert out.shape == (kk, t, cout), out.shape
    err = float(jnp.max(jnp.abs(out.astype(jnp.float32) - ref)))
    assert err < 2.5e-2, err

    # Path 2: two-pass tiled-N fallback (forced on the same small inputs for coverage).
    out2 = fcn_forward(x, w, b, gamma, beta, force_two_pass=True)
    jax.block_until_ready(out2)
    err2 = float(jnp.max(jnp.abs(out2.astype(jnp.float32) - ref)))
    assert err2 < 2.5e-2, err2

    print("KERNEL_OK")
</pallas_src>

<mosaic_0001>
module attributes {stable_mosaic.version = 11 : i64} {
  func.func @_fcn_resident_kernel(%arg0: i32, %arg1: memref<16x32xbf16, #tpu.memory_space<vmem>>, %arg2: memref<32x128xbf16, #tpu.memory_space<vmem>>, %arg3: memref<2x128xf32, #tpu.memory_space<vmem>>, %arg4: memref<16x128xbf16, #tpu.memory_space<vmem>>) attributes {dimension_semantics = [#tpu.dimension_semantics<parallel>], iteration_bounds = array<i64: 1>, scalar_prefetch = 0 : i64, scratch_operands = 0 : i64, tpu.core_type = #tpu.core_type<tc>, window_params = [{pipeline_mode = #tpu.pipeline_mode<synchronous>, transform_indices = @transform_0, window_bounds = array<i64: 16, 32>}, {transform_indices = @transform_1, window_bounds = array<i64: 32, 128>}, {transform_indices = @transform_2, window_bounds = array<i64: 2, 128>}, {transform_indices = @transform_3, window_bounds = array<i64: 16, 128>}]} {
    %c0 = arith.constant 0 : index
    %c0_0 = arith.constant 0 : index
    %0 = vector.load %arg1[%c0, %c0_0] : memref<16x32xbf16, #tpu.memory_space<vmem>>, vector<16x32xbf16>
    %c0_1 = arith.constant 0 : index
    %c0_2 = arith.constant 0 : index
    %1 = vector.load %arg2[%c0_1, %c0_2] : memref<32x128xbf16, #tpu.memory_space<vmem>>, vector<32x128xbf16>
    %cst = arith.constant dense<0.000000e+00> : vector<16x128xf32>
    %2 = tpu.matmul %0, %1, %cst {dimension_numbers = #tpu.dot_dimension_numbers<[1], [0], [0], [1], [0, 0, 1, 1], [], []>} : vector<16x32xbf16>, vector<32x128xbf16>, vector<16x128xf32> -> vector<16x128xf32>
    %cst_3 = arith.constant dense<0.000000e+00> : vector<128xf32>
    %3 = vector.multi_reduction <add>, %2, %cst_3 [0] : vector<16x128xf32> to vector<128xf32>
    %4 = vector.shape_cast %3 : vector<128xf32> to vector<1x128xf32>
    %cst_4 = arith.constant 6.250000e-02 : f32
    %5 = vector.broadcast %cst_4 : f32 to vector<1x128xf32>
    %6 = arith.mulf %4, %5 : vector<1x128xf32>
    %7 = arith.mulf %2, %2 : vector<16x128xf32>
    %cst_5 = arith.constant dense<0.000000e+00> : vector<128xf32>
    %8 = vector.multi_reduction <add>, %7, %cst_5 [0] : vector<16x128xf32> to vector<128xf32>
    %9 = vector.shape_cast %8 : vector<128xf32> to vector<1x128xf32>
    %cst_6 = arith.constant 6.250000e-02 : f32
    %10 = vector.broadcast %cst_6 : f32 to vector<1x128xf32>
    %11 = arith.mulf %9, %10 : vector<1x128xf32>
    %12 = arith.mulf %6, %6 : vector<1x128xf32>
    %13 = arith.subf %11, %12 : vector<1x128xf32>
    %cst_7 = arith.constant 0.000000e+00 : f32
    %14 = vector.broadcast %cst_7 : f32 to vector<1x128xf32>
    %15 = arith.maximumf %13, %14 : vector<1x128xf32>
    %cst_8 = arith.constant 9.99999974E-6 : f32
    %16 = vector.broadcast %cst_8 : f32 to vector<1x128xf32>
    %17 = arith.addf %15, %16 : vector<1x128xf32>
    %18 = math.rsqrt %17 : vector<1x128xf32>
    %c0_9 = arith.constant 0 : index
    %c0_10 = arith.constant 0 : index
    %19 = vector.load %arg3[%c0_9, %c0_10] : memref<2x128xf32, #tpu.memory_space<vmem>>, vector<1x128xf32>
    %20 = arith.mulf %19, %18 : vector<1x128xf32>
    %c1 = arith.constant 1 : index
    %c0_11 = arith.constant 0 : index
    %21 = vector.load %arg3[%c1, %c0_11] : memref<2x128xf32, #tpu.memory_space<vmem>>, vector<1x128xf32>
    %22 = arith.mulf %6, %20 : vector<1x128xf32>
    %23 = arith.subf %21, %22 : vector<1x128xf32>
    %24 = vector.broadcast %20 : vector<1x128xf32> to vector<16x128xf32>
    %25 = arith.mulf %2, %24 : vector<16x128xf32>
    %26 = vector.broadcast %23 : vector<1x128xf32> to vector<16x128xf32>
    %27 = arith.addf %25, %26 : vector<16x128xf32>
    %cst_12 = arith.constant 0.000000e+00 : f32
    %28 = vector.broadcast %cst_12 : f32 to vector<16x128xf32>
    %29 = arith.maximumf %27, %28 : vector<16x128xf32>
    %30 = arith.truncf %29 : vector<16x128xf32> to vector<16x128xbf16>
    %c0_13 = arith.constant 0 : index
    %c0_14 = arith.constant 0 : index
    %31 = vector.load %arg4[%c0_13, %c0_14] : memref<16x128xbf16, #tpu.memory_space<vmem>>, vector<16x128xbf16>
    tpu.vector_store %arg4[%c0_13, %c0_14], %30 {strides = array<i32>} : memref<16x128xbf16, #tpu.memory_space<vmem>>, vector<16x128xbf16>,
    return
  }
  func.func @transform_0(%arg0: i32) -> (i32, i32) {
    %c0_i32 = arith.constant 0 : i32
    %c0_i32_0 = arith.constant 0 : i32
    %c0_i32_1 = arith.constant 0 : i32
    return %c0_i32, %c0_i32_0 : i32, i32
  }
  func.func @transform_1(%arg0: i32) -> (i32, i32) {
    %c0_i32 = arith.constant 0 : i32
    %c0_i32_0 = arith.constant 0 : i32
    return %c0_i32, %arg0 : i32, i32
  }
  func.func @transform_2(%arg0: i32) -> (i32, i32) {
    %c0_i32 = arith.constant 0 : i32
    %c0_i32_0 = arith.constant 0 : i32
    return %c0_i32, %arg0 : i32, i32
  }
  func.func @transform_3(%arg0: i32) -> (i32, i32) {
    %c0_i32 = arith.constant 0 : i32
    %c0_i32_0 = arith.constant 0 : i32
    return %c0_i32, %arg0 : i32, i32
  }
}

</mosaic_0001>

<bundles_post_ra>
// kernel: tpu_custom_call.1
= control target key start
LH: loop header
LB: loop body
LE: loop exit
PB: predicated region body
PF: predicated region fallthrough
CT: control target
= control target key end

     0   :  { %8 = vsyncpa [#allocation3], 0  ;;  %s416_s0 = inlined_call_operand.hbm [shape: bf16[16,32], index: 0, kind: input, shape index: {}]   ;;  %s417_s1 = inlined_call_operand.hbm [shape: bf16[32,128], index: 1, kind: input, shape index: {}]   ;;  %s418_s2 = inlined_call_operand.hbm [shape: f32[2,128], index: 2, kind: input, shape index: {}]   ;;  %s419_s3 = inlined_call_operand.hbm [shape: bf16[16,128], index: 3, kind: output, shape index: {}]  }
   0x1   :  { %9 = vsyncpa [#allocation6], 0 }
   0x2   :  { %10 = vsyncpa [#allocation4], 0  ;;  %s324_s12 = smov [#allocation5]   ;;  %s325_s14 = smov [#allocation2]  }
   0x3   :  { %s28_s13 = sshll.u32 %s324_s12, 4  ;;  %s16_s15 = sshll.u32 %s325_s14, 4  ;;  %s29_s13 = int_to_ptr.vmem [resolvable:$true] %s28_s13  ;;  %s352_s15 = int_to_ptr.vmem [resolvable:$true] %s16_s15 }
   0x4   :  { %s230_s18 = scalar_lea.hbm %s417_s1, 256 }
   0x5   :  { %p231_p0 = scmp.ne.s32.totalorder %s417_s1, %s230_s18  ;;  %p234_p1 = scmp.lt.u32.totalorder %s230_s18, %s417_s1 }
   0x7   :  { %p236_p2 = pnand %p234_p1, %p231_p0 }
   0x9   :  { %239 = shalt.err (!%p236_p2)
}
   0xa   :  { %s240_s23 = scalar_lea.vmem %s29_s13, 256  ;;  %p245_p4 = scmp.lt.s32.totalorder %s29_s13, %s29_s13 }
   0xb   :  { %p241_p3 = scmp.ne.s32.totalorder %s29_s13, %s240_s23  ;;  %p246_p5 = scmp.lt.s32.totalorder %s240_s23, %s240_s23 }
   0xd   :  { %p247_p6 = por %p246_p5, %p245_p4 }
   0xf   :  { %p248_p7 = pnand %p247_p6, %p241_p3 }
  0x11   :  { %251 = shalt.err (!%p248_p7)
}
  0x12   :  { %s326_s24 = smov 64   ;;  %s327_s25 = smov 4  }
  0x13   :  { %34 = dma.hbm_to_vmem [thread:$0]  %s417_s1, 256, %s29_s13, [#allocation6], %s326_s24, %s326_s24, %s327_s25  }
  0x14   :  { %s252_s30 = scalar_lea.hbm %s416_s0, 128 }
  0x15   :  { %p253_p8 = scmp.ne.s32.totalorder %s416_s0, %s252_s30  ;;  %p256_p9 = scmp.lt.u32.totalorder %s252_s30, %s416_s0 }
  0x17   :  { %p258_p10 = pnand %p256_p9, %p253_p8 }
  0x19   :  { %261 = shalt.err (!%p258_p10)
}
  0x1a   :  { %s262_s8 = scalar_lea.vmem %s352_s15, 128  ;;  %p267_p12 = scmp.lt.s32.totalorder %s352_s15, %s352_s15 }
  0x1b   :  { %p263_p11 = scmp.ne.s32.totalorder %s352_s15, %s262_s8  ;;  %p268_p13 = scmp.lt.s32.totalorder %s262_s8, %s262_s8 }
  0x1d   :  { %p269_p0 = por %p268_p13, %p267_p12 }
  0x1f   :  { %p270_p1 = pnand %p269_p0, %p263_p11 }
  0x21   :  { %273 = shalt.err (!%p270_p1)
}
  0x22   :  { %22 = dma.hbm_to_vmem [thread:$0]  %s416_s0, 128, %s352_s15, [#allocation3], %s326_s24, %s326_s24, %s327_s25  }
  0x23   :  { %s328_s10 = smov [#allocation7]   ;;  %s274_s14 = scalar_lea.hbm %s418_s2, 32 }
  0x24   :  { %s41_s11 = sshll.u32 %s328_s10, 4  ;;  %p275_p2 = scmp.ne.s32.totalorder %s418_s2, %s274_s14  ;;  %s42_s11 = int_to_ptr.vmem [resolvable:$true] %s41_s11 }
  0x25   :  { %p278_p3 = scmp.lt.u32.totalorder %s274_s14, %s418_s2 }
  0x27   :  { %p280_p4 = pnand %p278_p3, %p275_p2 }
  0x29   :  { %283 = shalt.err (!%p280_p4)
}
  0x2a   :  { %s284_s20 = scalar_lea.vmem %s42_s11, 32  ;;  %p289_p6 = scmp.lt.s32.totalorder %s42_s11, %s42_s11 }
  0x2b   :  { %p285_p5 = scmp.ne.s32.totalorder %s42_s11, %s284_s20  ;;  %p290_p7 = scmp.lt.s32.totalorder %s284_s20, %s284_s20 }
  0x2d   :  { %p291_p8 = por %p290_p7, %p289_p6 }
  0x2f   :  { %p292_p9 = pnand %p291_p8, %p285_p5 }
  0x31   :  { %295 = shalt.err (!%p292_p9)
}
  0x32   :  { %44 = dma.hbm_to_vmem [thread:$0]  %s418_s2, 32, %s42_s11, [#allocation6]  }
  0x33   :  { %318 = dma.done.wait [#allocation3], 128  }
  0x34   :  { %319 = vsyncadd [#allocation3], 4294967168 }
  0x35   :  { %320 = dma.done.wait [#allocation6], 288  }
  0x36   :  { %321 = vsyncadd [#allocation6], 4294967008  ;;  %v329_v0 = vmov 0.0   ;;  %vm330_vm0 = vmmov 0   ;;  %v225_v1 = vld [vmem:[#allocation5] sm:$0xff]   ;;  %v226_v2 = vld [vmem:[#allocation5 + $0x8] sm:$0xff]   ;;  %v151_v30 = vlaneseq }
  0x37   :  { %209 = vmatprep.subr.bf16.mxu0 %v329_v0  ;;  %213 = vmatprep.mubr.msk.bf16.mxu0 %vm330_vm0, %v329_v0  ;;  %v227_v3 = vld [vmem:[#allocation2] sm:$0xff]   ;;  %vm78_vm1 = vcmask 261120   ;;  %v146_v32 = vld [vmem:[#allocation7] sm:$0x1]  ;;  %v148_v36 = vld [vmem:[#allocation7 + $0x1] sm:$0x1] }
  0x38   :  { %210 = vmatpush3.bf16.msra.mxu0 %v225_v1  ;;  %v152_v31 = vshrl.u32 %v151_v30, 7  ;;  %s331_s2 = smov [#allocation8]  }
  0x39   :  { %211 = vmatprep.subr.bf16.mxu0 %v329_v0  ;;  %s180_s21 = sshll.u32 %s331_s2, 4  ;;  %s181_s21 = int_to_ptr.vmem [resolvable:$true] %s180_s21 }
  0x3a   :  { %v153_v33 = vsub.s32 0, %v152_v31  ;;  %s296_s22 = scalar_lea.vmem %s181_s21, 128  ;;  %p301_p11 = scmp.lt.s32.totalorder %s181_s21, %s181_s21 }
  0x3b   :  { %p297_p10 = scmp.ne.s32.totalorder %s181_s21, %s296_s22  ;;  %p302_p12 = scmp.lt.s32.totalorder %s296_s22, %s296_s22 }
  0x3c   :  { %212 = vmatpush3.bf16.msra.mxu0 %v226_v2 }
  0x3d   :  { %p303_p13 = por %p302_p12, %p301_p11 }
  0x3f   :  { %214 = vmatmul.mubr.msk.bf16.vlgmr.msra.gmra.mrb[0].mxu0 %vm78_vm1, %v227_v3  ;;  %p304_p0 = pnand %p303_p13, %p297_p10 }
 0x112   :  { %v116_v4 = vpop.f32.mrb[0].mxu0 }
 0x113   :  { %v215_v5 = vpop.f32.mrb[1].mxu0  ;;  %v131_v7 = vmul.f32 %v116_v4, %v116_v4 }
 0x114   :  { %v119_v6 = vpop.f32.mrb[2].mxu0 }
 0x115   :  { %v123_v8 = vadd.f32 %v119_v6, %v116_v4  ;;  %v132_v9 = vmul.f32 %v119_v6, %v119_v6  ;;  %v216_v10 = vpop.f32.mrb[3].mxu0 }
 0x117   :  { %v124_v11 = vrot.slane %v123_v8, 4  ;;  %v133_v12 = vadd.f32 %v132_v9, %v131_v7 }
 0x119   :  { %v125_v13 = vadd.f32 %v124_v11, %v123_v8  ;;  %v134_v14 = vrot.slane %v133_v12, 4 }
 0x11b   :  { %v126_v15 = vrot.slane %v125_v13, 2  ;;  %v135_v16 = vadd.f32 %v134_v14, %v133_v12 }
 0x11d   :  { %v127_v17 = vadd.f32 %v126_v15, %v125_v13  ;;  %v136_v18 = vrot.slane %v135_v16, 2 }
 0x11f   :  { %v128_v19 = vrot.slane %v127_v17, 1  ;;  %v137_v20 = vadd.f32 %v136_v18, %v135_v16 }
 0x121   :  { %v129_v21 = vadd.f32 %v128_v19, %v127_v17  ;;  %v138_v22 = vrot.slane %v137_v20, 1 }
 0x123   :  { %v130_v23 = vmul.f32 0.0625, %v129_v21  ;;  %v139_v24 = vadd.f32 %v138_v22, %v137_v20 }
 0x125   :  { %v140_v25 = vmul.f32 0.0625, %v139_v24  ;;  %v141_v26 = vmul.f32 %v130_v23, %v130_v23 }
 0x127   :  { %v142_v27 = vsub.f32 %v140_v25, %v141_v26 }
 0x129   :  { %v143_v28 = vmax.f32 %v142_v27, 0.0 }
 0x12b   :  { %v144_v29 = vadd.f32 1e-05, %v143_v28 }
 0x12d   :  { %228 = vrsqrt.f32 %v144_v29 }
 0x137   :  { %v229_v34 = vpop.eup %228 }
 0x138   :  { %v147_v35 = vmul.f32 %v229_v34, %v146_v32 }
 0x13a   :  { %v149_v37 = vmul.f32 %v147_v35, %v130_v23  ;;  %v154_v38 = vrot.slane %v147_v35, %v153_v33 }
 0x13c   :  { %v150_v39 = vsub.f32 %v148_v36, %v149_v37  ;;  %v155_v40 = vmul.f32 %v154_v38, %v116_v4  ;;  %v156_v41 = vmul.f32 %v154_v38, %v119_v6 }
 0x13e   :  { %v160_v42 = vrot.slane %v150_v39, %v153_v33 }
 0x140   :  { %v162_v43 = vadd.f32 %v160_v42, %v156_v41  ;;  %v161_v44 = vadd.f32 %v160_v42, %v155_v40 }
 0x142   :  { %v163_v45 = vmax.f32 %v161_v44, 0.0  ;;  %v164_v46 = vmax.f32 %v162_v43, 0.0 }
 0x144   :  { %v204_v47 = vpack.c.bf16 %v164_v46, %v163_v45 }
 0x146   :  { %205 = vst [vmem:[#allocation8] sm:$0xff] %v204_v47  }
 0x147   :  { %307 = shalt.err (!%p304_p0)
}
 0x148   :  { %s308_s27 = scalar_lea.hbm %s419_s3, 128 }
 0x149   :  { %p309_p1 = scmp.ne.s32.totalorder %s419_s3, %s308_s27  ;;  %p312_p2 = scmp.lt.u32.totalorder %s308_s27, %s419_s3 }
 0x14b   :  { %p314_p3 = pnand %p312_p2, %p309_p1 }
 0x14d   :  { %317 = shalt.err (!%p314_p3)
}
 0x14e   :  { %186 = dma.vmem_to_hbm [thread:$0]  %s181_s21, 128, %s419_s3, [#allocation4], %s326_s24, %s326_s24, %s327_s25  }
 0x14f   :  { %322 = dma.done.wait [#allocation4], 128  }
 0x150   :  { %323 = vsyncadd [#allocation4], 4294967168 }
 0x151   :  { %190 = vsyncpa [#allocation3], 1 }
 0x152   :  { %191 = vsyncpa [#allocation6], 1 }
 0x153   :  { %192 = vsyncpa [#allocation4], 1 }

</bundles_post_ra>
